<compile_context>
chip_gen: v5e
topology: v5e:2x2
jax: 0.10.0
libtpu: 0.0.40
codegen_flags: <defaults>
</compile_context>

<pallas_src>
import jax
import jax.numpy as jnp
from jax.experimental import pallas as pl
from jax.experimental.pallas import tpu as pltpu

SUBLANE = 8  # f32 sublane granule


def rnn_last_hidden_kernel(tok_ref, proj_ref, whh_t_ref, out_ref, p_ref):
    """Fused gather + Elman-RNN recurrence; writes only the final hidden state.

    tok_ref:   (B, T)      int32, SMEM (scalar prefetch) token ids
    proj_ref:  (V_pad, H)  f32, VMEM: embedding @ W_ih^T + (b_ih + b_hh)
    whh_t_ref: (H, H)      f32, VMEM: W_hh^T
    out_ref:   (B, H)      f32: final hidden state h_n
    p_ref:     (T, 8, H)   f32 VMEM scratch: gathered, sublane-padded per-step
                           input projections (time-major)
    """
    B, H = out_ref.shape
    T = p_ref.shape[0]

    # Zero scratch once so the padding rows (b >= B) are well-defined.
    p_ref[...] = jnp.zeros_like(p_ref)

    # Fused embedding + input-projection gather: T*B dynamic single-row copies
    # from the precomputed table into a time-major, sublane-aligned layout.
    # Off the serial critical path (independent of the recurrence).
    for t in range(T):
        for b in range(B):
            tok = tok_ref[b, t]
            p_ref[t, pl.ds(b, 1), :] = proj_ref[pl.ds(tok, 1), :]

    whh_t = whh_t_ref[...]
    # Carry padded to the sublane granule: rows >= B are inert padding
    # (matmul rows are independent, tanh is elementwise) and never read back.
    h = jnp.zeros((SUBLANE, H), jnp.float32)
    # Serial recurrence, fully unrolled for small fixed T (static indices):
    # one aligned (8,H)@(H,H) MXU push + one EUP tanh per dependent step.
    for t in range(T):
        h = jnp.tanh(
            p_ref[t] + jnp.dot(h, whh_t, preferred_element_type=jnp.float32)
        )
    out_ref[...] = h[:B].astype(out_ref.dtype)


def prepare_inference_params(params):
    """One-time param prep (inference-only algebraic fold + pre-transpose)."""
    emb = params["embedding"]                                   # (V, D)
    V, _ = emb.shape
    H = params["w_hh"].shape[0]
    b = params["b_ih"] + params["b_hh"]                         # (H,)
    proj = jnp.dot(emb, params["w_ih"].T,
                   preferred_element_type=jnp.float32) + b      # (V, H)
    v_pad = ((V + SUBLANE - 1) // SUBLANE) * SUBLANE
    proj = jnp.pad(proj, ((0, v_pad - V), (0, 0)))              # sublane-align V
    return {
        "proj_table": proj.astype(jnp.float32),                 # (V_pad, H)
        "whh_t": params["w_hh"].T.astype(jnp.float32),          # (H, H)
    }


def nlp_mult_classify_forward(x_tokens, infer_params):
    """Forward pass of NLPMultClassify with y=None: returns rnn(x)[1].squeeze()."""
    proj = infer_params["proj_table"]
    whh_t = infer_params["whh_t"]
    B, T = x_tokens.shape
    v_pad, H = proj.shape

    h_n = pl.pallas_call(
        rnn_last_hidden_kernel,
        out_shape=jax.ShapeDtypeStruct((B, H), jnp.float32),
        grid_spec=pltpu.PrefetchScalarGridSpec(
            num_scalar_prefetch=1,            # token ids -> SMEM
            grid=(1,),                        # single invocation, all in VMEM
            in_specs=[
                pl.BlockSpec((v_pad, H), lambda i, tok: (0, 0)),  # proj_table
                pl.BlockSpec((H, H), lambda i, tok: (0, 0)),      # W_hh^T
            ],
            out_specs=pl.BlockSpec((B, H), lambda i, tok: (0, 0)),
            scratch_shapes=[pltpu.VMEM((T, SUBLANE, H), jnp.float32)],
        ),
        compiler_params=pltpu.CompilerParams(
            dimension_semantics=("arbitrary",)),  # recurrence is sequential
    )(x_tokens.astype(jnp.int32), proj, whh_t)

    if B == 1:                                # mirror torch .squeeze() for B==1
        h_n = h_n[0]
    return h_n                                # (B, H) for B > 1


def init_params(key, vocab_size, str_dim, input_size, hidden_size):
    assert str_dim == input_size, "RNN input_size must match embedding dim"
    k_emb, k_wih, k_whh, k_bih, k_bhh = jax.random.split(key, 5)
    bound = 1.0 / jnp.sqrt(hidden_size)
    return {
        "embedding": jax.random.normal(k_emb, (vocab_size, str_dim), jnp.float32),
        "w_ih": jax.random.uniform(k_wih, (hidden_size, input_size), jnp.float32,
                                   -bound, bound),
        "w_hh": jax.random.uniform(k_whh, (hidden_size, hidden_size), jnp.float32,
                                   -bound, bound),
        "b_ih": jax.random.uniform(k_bih, (hidden_size,), jnp.float32, -bound, bound),
        "b_hh": jax.random.uniform(k_bhh, (hidden_size,), jnp.float32, -bound, bound),
    }


def _reference_forward(x_tokens, params):
    """Pure-JAX reference (lax.scan) mirroring torch.nn.RNN(batch_first=True)."""
    x_emb = jnp.take(params["embedding"], x_tokens, axis=0)   # (B, T, D)
    B = x_emb.shape[0]
    H = params["w_hh"].shape[0]
    h0 = jnp.zeros((B, H), jnp.float32)

    def step(h, x_t):
        h_new = jnp.tanh(x_t @ params["w_ih"].T + params["b_ih"]
                         + h @ params["w_hh"].T + params["b_hh"])
        return h_new, None

    h_n, _ = jax.lax.scan(step, h0, jnp.transpose(x_emb, (1, 0, 2)))
    return h_n


if __name__ == "__main__":
    # Small shapes consistent with the module: vocab=30, str_dim=input_size=32,
    # hidden_size=32, batch=2, seq_len=8.
    VOCAB, D, H, B, T = 30, 32, 32, 2, 8

    key = jax.random.PRNGKey(0)
    k_params, k_tokens = jax.random.split(key)
    params = init_params(k_params, VOCAB, D, D, H)
    infer_params = prepare_inference_params(params)
    x_tokens = jax.random.randint(k_tokens, (B, T), 0, VOCAB, dtype=jnp.int32)

    y_pred = nlp_mult_classify_forward(x_tokens, infer_params)
    y_pred = jax.block_until_ready(y_pred)

    ref = jax.block_until_ready(_reference_forward(x_tokens, params))
    assert y_pred.shape == (B, H)
    assert jnp.allclose(y_pred, ref, atol=2e-5, rtol=1e-5)

    print("KERNEL_OK")
</pallas_src>

<mosaic_0001>
module attributes {stable_mosaic.version = 11 : i64} {
  func.func @rnn_last_hidden_kernel(%arg0: i32, %arg1: memref<2x8xi32, #tpu.memory_space<smem>>, %arg2: memref<32x32xf32, #tpu.memory_space<vmem>>, %arg3: memref<32x32xf32, #tpu.memory_space<vmem>>, %arg4: memref<2x32xf32, #tpu.memory_space<vmem>>, %arg5: memref<8x8x32xf32, #tpu.memory_space<vmem>>) attributes {dimension_semantics = [#tpu.dimension_semantics<arbitrary>], iteration_bounds = array<i64: 1>, scalar_prefetch = 1 : i64, scratch_operands = 1 : i64, tpu.core_type = #tpu.core_type<tc>, window_params = [{pipeline_mode = #tpu.pipeline_mode<synchronous>, transform_indices = @transform_0, window_bounds = array<i64: 32, 32>}, {pipeline_mode = #tpu.pipeline_mode<synchronous>, transform_indices = @transform_1, window_bounds = array<i64: 32, 32>}, {pipeline_mode = #tpu.pipeline_mode<synchronous>, transform_indices = @transform_2, window_bounds = array<i64: 2, 32>}]} {
    %cst = arith.constant 0.000000e+00 : f32
    %0 = vector.broadcast %cst : f32 to vector<8x8x32xf32>
    %c0 = arith.constant 0 : index
    %c0_0 = arith.constant 0 : index
    %c0_1 = arith.constant 0 : index
    %1 = vector.load %arg5[%c0, %c0_0, %c0_1] : memref<8x8x32xf32, #tpu.memory_space<vmem>>, vector<8x8x32xf32>
    tpu.vector_store %arg5[%c0, %c0_0, %c0_1], %0 {strides = array<i32>} : memref<8x8x32xf32, #tpu.memory_space<vmem>>, vector<8x8x32xf32>,
    %c0_2 = arith.constant 0 : index
    %c0_3 = arith.constant 0 : index
    %2 = memref.load %arg1[%c0_2, %c0_3] : memref<2x8xi32, #tpu.memory_space<smem>>
    %3 = arith.index_cast %2 : i32 to index
    %c0_4 = arith.constant 0 : index
    %4 = vector.load %arg2[%3, %c0_4] : memref<32x32xf32, #tpu.memory_space<vmem>>, vector<1x32xf32>
    %c0_5 = arith.constant 0 : index
    %c0_6 = arith.constant 0 : index
    %c0_7 = arith.constant 0 : index
    %5 = vector.load %arg5[%c0_5, %c0_6, %c0_7] : memref<8x8x32xf32, #tpu.memory_space<vmem>>, vector<1x1x32xf32>
    %6 = vector.shape_cast %5 : vector<1x1x32xf32> to vector<1x32xf32>
    %7 = vector.shape_cast %4 : vector<1x32xf32> to vector<1x1x32xf32>
    tpu.vector_store %arg5[%c0_5, %c0_6, %c0_7], %7 {strides = array<i32>} : memref<8x8x32xf32, #tpu.memory_space<vmem>>, vector<1x1x32xf32>,
    %c1 = arith.constant 1 : index
    %c0_8 = arith.constant 0 : index
    %8 = memref.load %arg1[%c1, %c0_8] : memref<2x8xi32, #tpu.memory_space<smem>>
    %9 = arith.index_cast %8 : i32 to index
    %c0_9 = arith.constant 0 : index
    %10 = vector.load %arg2[%9, %c0_9] : memref<32x32xf32, #tpu.memory_space<vmem>>, vector<1x32xf32>
    %c0_10 = arith.constant 0 : index
    %c1_11 = arith.constant 1 : index
    %c0_12 = arith.constant 0 : index
    %11 = vector.load %arg5[%c0_10, %c1_11, %c0_12] : memref<8x8x32xf32, #tpu.memory_space<vmem>>, vector<1x1x32xf32>
    %12 = vector.shape_cast %11 : vector<1x1x32xf32> to vector<1x32xf32>
    %13 = vector.shape_cast %10 : vector<1x32xf32> to vector<1x1x32xf32>
    tpu.vector_store %arg5[%c0_10, %c1_11, %c0_12], %13 {strides = array<i32>} : memref<8x8x32xf32, #tpu.memory_space<vmem>>, vector<1x1x32xf32>,
    %c0_13 = arith.constant 0 : index
    %c1_14 = arith.constant 1 : index
    %14 = memref.load %arg1[%c0_13, %c1_14] : memref<2x8xi32, #tpu.memory_space<smem>>
    %15 = arith.index_cast %14 : i32 to index
    %c0_15 = arith.constant 0 : index
    %16 = vector.load %arg2[%15, %c0_15] : memref<32x32xf32, #tpu.memory_space<vmem>>, vector<1x32xf32>
    %c1_16 = arith.constant 1 : index
    %c0_17 = arith.constant 0 : index
    %c0_18 = arith.constant 0 : index
    %17 = vector.load %arg5[%c1_16, %c0_17, %c0_18] : memref<8x8x32xf32, #tpu.memory_space<vmem>>, vector<1x1x32xf32>
    %18 = vector.shape_cast %17 : vector<1x1x32xf32> to vector<1x32xf32>
    %19 = vector.shape_cast %16 : vector<1x32xf32> to vector<1x1x32xf32>
    tpu.vector_store %arg5[%c1_16, %c0_17, %c0_18], %19 {strides = array<i32>} : memref<8x8x32xf32, #tpu.memory_space<vmem>>, vector<1x1x32xf32>,
    %c1_19 = arith.constant 1 : index
    %c1_20 = arith.constant 1 : index
    %20 = memref.load %arg1[%c1_19, %c1_20] : memref<2x8xi32, #tpu.memory_space<smem>>
    %21 = arith.index_cast %20 : i32 to index
    %c0_21 = arith.constant 0 : index
    %22 = vector.load %arg2[%21, %c0_21] : memref<32x32xf32, #tpu.memory_space<vmem>>, vector<1x32xf32>
    %c1_22 = arith.constant 1 : index
    %c1_23 = arith.constant 1 : index
    %c0_24 = arith.constant 0 : index
    %23 = vector.load %arg5[%c1_22, %c1_23, %c0_24] : memref<8x8x32xf32, #tpu.memory_space<vmem>>, vector<1x1x32xf32>
    %24 = vector.shape_cast %23 : vector<1x1x32xf32> to vector<1x32xf32>
    %25 = vector.shape_cast %22 : vector<1x32xf32> to vector<1x1x32xf32>
    tpu.vector_store %arg5[%c1_22, %c1_23, %c0_24], %25 {strides = array<i32>} : memref<8x8x32xf32, #tpu.memory_space<vmem>>, vector<1x1x32xf32>,
    %c0_25 = arith.constant 0 : index
    %c2 = arith.constant 2 : index
    %26 = memref.load %arg1[%c0_25, %c2] : memref<2x8xi32, #tpu.memory_space<smem>>
    %27 = arith.index_cast %26 : i32 to index
    %c0_26 = arith.constant 0 : index
    %28 = vector.load %arg2[%27, %c0_26] : memref<32x32xf32, #tpu.memory_space<vmem>>, vector<1x32xf32>
    %c2_27 = arith.constant 2 : index
    %c0_28 = arith.constant 0 : index
    %c0_29 = arith.constant 0 : index
    %29 = vector.load %arg5[%c2_27, %c0_28, %c0_29] : memref<8x8x32xf32, #tpu.memory_space<vmem>>, vector<1x1x32xf32>
    %30 = vector.shape_cast %29 : vector<1x1x32xf32> to vector<1x32xf32>
    %31 = vector.shape_cast %28 : vector<1x32xf32> to vector<1x1x32xf32>
    tpu.vector_store %arg5[%c2_27, %c0_28, %c0_29], %31 {strides = array<i32>} : memref<8x8x32xf32, #tpu.memory_space<vmem>>, vector<1x1x32xf32>,
    %c1_30 = arith.constant 1 : index
    %c2_31 = arith.constant 2 : index
    %32 = memref.load %arg1[%c1_30, %c2_31] : memref<2x8xi32, #tpu.memory_space<smem>>
    %33 = arith.index_cast %32 : i32 to index
    %c0_32 = arith.constant 0 : index
    %34 = vector.load %arg2[%33, %c0_32] : memref<32x32xf32, #tpu.memory_space<vmem>>, vector<1x32xf32>
    %c2_33 = arith.constant 2 : index
    %c1_34 = arith.constant 1 : index
    %c0_35 = arith.constant 0 : index
    %35 = vector.load %arg5[%c2_33, %c1_34, %c0_35] : memref<8x8x32xf32, #tpu.memory_space<vmem>>, vector<1x1x32xf32>
    %36 = vector.shape_cast %35 : vector<1x1x32xf32> to vector<1x32xf32>
    %37 = vector.shape_cast %34 : vector<1x32xf32> to vector<1x1x32xf32>
    tpu.vector_store %arg5[%c2_33, %c1_34, %c0_35], %37 {strides = array<i32>} : memref<8x8x32xf32, #tpu.memory_space<vmem>>, vector<1x1x32xf32>,
    %c0_36 = arith.constant 0 : index
    %c3 = arith.constant 3 : index
    %38 = memref.load %arg1[%c0_36, %c3] : memref<2x8xi32, #tpu.memory_space<smem>>
    %39 = arith.index_cast %38 : i32 to index
    %c0_37 = arith.constant 0 : index
    %40 = vector.load %arg2[%39, %c0_37] : memref<32x32xf32, #tpu.memory_space<vmem>>, vector<1x32xf32>
    %c3_38 = arith.constant 3 : index
    %c0_39 = arith.constant 0 : index
    %c0_40 = arith.constant 0 : index
    %41 = vector.load %arg5[%c3_38, %c0_39, %c0_40] : memref<8x8x32xf32, #tpu.memory_space<vmem>>, vector<1x1x32xf32>
    %42 = vector.shape_cast %41 : vector<1x1x32xf32> to vector<1x32xf32>
    %43 = vector.shape_cast %40 : vector<1x32xf32> to vector<1x1x32xf32>
    tpu.vector_store %arg5[%c3_38, %c0_39, %c0_40], %43 {strides = array<i32>} : memref<8x8x32xf32, #tpu.memory_space<vmem>>, vector<1x1x32xf32>,
    %c1_41 = arith.constant 1 : index
    %c3_42 = arith.constant 3 : index
    %44 = memref.load %arg1[%c1_41, %c3_42] : memref<2x8xi32, #tpu.memory_space<smem>>
    %45 = arith.index_cast %44 : i32 to index
    %c0_43 = arith.constant 0 : index
    %46 = vector.load %arg2[%45, %c0_43] : memref<32x32xf32, #tpu.memory_space<vmem>>, vector<1x32xf32>
    %c3_44 = arith.constant 3 : index
    %c1_45 = arith.constant 1 : index
    %c0_46 = arith.constant 0 : index
    %47 = vector.load %arg5[%c3_44, %c1_45, %c0_46] : memref<8x8x32xf32, #tpu.memory_space<vmem>>, vector<1x1x32xf32>
    %48 = vector.shape_cast %47 : vector<1x1x32xf32> to vector<1x32xf32>
    %49 = vector.shape_cast %46 : vector<1x32xf32> to vector<1x1x32xf32>
    tpu.vector_store %arg5[%c3_44, %c1_45, %c0_46], %49 {strides = array<i32>} : memref<8x8x32xf32, #tpu.memory_space<vmem>>, vector<1x1x32xf32>,
    %c0_47 = arith.constant 0 : index
    %c4 = arith.constant 4 : index
    %50 = memref.load %arg1[%c0_47, %c4] : memref<2x8xi32, #tpu.memory_space<smem>>
    %51 = arith.index_cast %50 : i32 to index
    %c0_48 = arith.constant 0 : index
    %52 = vector.load %arg2[%51, %c0_48] : memref<32x32xf32, #tpu.memory_space<vmem>>, vector<1x32xf32>
    %c4_49 = arith.constant 4 : index
    %c0_50 = arith.constant 0 : index
    %c0_51 = arith.constant 0 : index
    %53 = vector.load %arg5[%c4_49, %c0_50, %c0_51] : memref<8x8x32xf32, #tpu.memory_space<vmem>>, vector<1x1x32xf32>
    %54 = vector.shape_cast %53 : vector<1x1x32xf32> to vector<1x32xf32>
    %55 = vector.shape_cast %52 : vector<1x32xf32> to vector<1x1x32xf32>
    tpu.vector_store %arg5[%c4_49, %c0_50, %c0_51], %55 {strides = array<i32>} : memref<8x8x32xf32, #tpu.memory_space<vmem>>, vector<1x1x32xf32>,
    %c1_52 = arith.constant 1 : index
    %c4_53 = arith.constant 4 : index
    %56 = memref.load %arg1[%c1_52, %c4_53] : memref<2x8xi32, #tpu.memory_space<smem>>
    %57 = arith.index_cast %56 : i32 to index
    %c0_54 = arith.constant 0 : index
    %58 = vector.load %arg2[%57, %c0_54] : memref<32x32xf32, #tpu.memory_space<vmem>>, vector<1x32xf32>
    %c4_55 = arith.constant 4 : index
    %c1_56 = arith.constant 1 : index
    %c0_57 = arith.constant 0 : index
    %59 = vector.load %arg5[%c4_55, %c1_56, %c0_57] : memref<8x8x32xf32, #tpu.memory_space<vmem>>, vector<1x1x32xf32>
    %60 = vector.shape_cast %59 : vector<1x1x32xf32> to vector<1x32xf32>
    %61 = vector.shape_cast %58 : vector<1x32xf32> to vector<1x1x32xf32>
    tpu.vector_store %arg5[%c4_55, %c1_56, %c0_57], %61 {strides = array<i32>} : memref<8x8x32xf32, #tpu.memory_space<vmem>>, vector<1x1x32xf32>,
    %c0_58 = arith.constant 0 : index
    %c5 = arith.constant 5 : index
    %62 = memref.load %arg1[%c0_58, %c5] : memref<2x8xi32, #tpu.memory_space<smem>>
    %63 = arith.index_cast %62 : i32 to index
    %c0_59 = arith.constant 0 : index
    %64 = vector.load %arg2[%63, %c0_59] : memref<32x32xf32, #tpu.memory_space<vmem>>, vector<1x32xf32>
    %c5_60 = arith.constant 5 : index
    %c0_61 = arith.constant 0 : index
    %c0_62 = arith.constant 0 : index
    %65 = vector.load %arg5[%c5_60, %c0_61, %c0_62] : memref<8x8x32xf32, #tpu.memory_space<vmem>>, vector<1x1x32xf32>
    %66 = vector.shape_cast %65 : vector<1x1x32xf32> to vector<1x32xf32>
    %67 = vector.shape_cast %64 : vector<1x32xf32> to vector<1x1x32xf32>
    tpu.vector_store %arg5[%c5_60, %c0_61, %c0_62], %67 {strides = array<i32>} : memref<8x8x32xf32, #tpu.memory_space<vmem>>, vector<1x1x32xf32>,
    %c1_63 = arith.constant 1 : index
    %c5_64 = arith.constant 5 : index
    %68 = memref.load %arg1[%c1_63, %c5_64] : memref<2x8xi32, #tpu.memory_space<smem>>
    %69 = arith.index_cast %68 : i32 to index
    %c0_65 = arith.constant 0 : index
    %70 = vector.load %arg2[%69, %c0_65] : memref<32x32xf32, #tpu.memory_space<vmem>>, vector<1x32xf32>
    %c5_66 = arith.constant 5 : index
    %c1_67 = arith.constant 1 : index
    %c0_68 = arith.constant 0 : index
    %71 = vector.load %arg5[%c5_66, %c1_67, %c0_68] : memref<8x8x32xf32, #tpu.memory_space<vmem>>, vector<1x1x32xf32>
    %72 = vector.shape_cast %71 : vector<1x1x32xf32> to vector<1x32xf32>
    %73 = vector.shape_cast %70 : vector<1x32xf32> to vector<1x1x32xf32>
    tpu.vector_store %arg5[%c5_66, %c1_67, %c0_68], %73 {strides = array<i32>} : memref<8x8x32xf32, #tpu.memory_space<vmem>>, vector<1x1x32xf32>,
    %c0_69 = arith.constant 0 : index
    %c6 = arith.constant 6 : index
    %74 = memref.load %arg1[%c0_69, %c6] : memref<2x8xi32, #tpu.memory_space<smem>>
    %75 = arith.index_cast %74 : i32 to index
    %c0_70 = arith.constant 0 : index
    %76 = vector.load %arg2[%75, %c0_70] : memref<32x32xf32, #tpu.memory_space<vmem>>, vector<1x32xf32>
    %c6_71 = arith.constant 6 : index
    %c0_72 = arith.constant 0 : index
    %c0_73 = arith.constant 0 : index
    %77 = vector.load %arg5[%c6_71, %c0_72, %c0_73] : memref<8x8x32xf32, #tpu.memory_space<vmem>>, vector<1x1x32xf32>
    %78 = vector.shape_cast %77 : vector<1x1x32xf32> to vector<1x32xf32>
    %79 = vector.shape_cast %76 : vector<1x32xf32> to vector<1x1x32xf32>
    tpu.vector_store %arg5[%c6_71, %c0_72, %c0_73], %79 {strides = array<i32>} : memref<8x8x32xf32, #tpu.memory_space<vmem>>, vector<1x1x32xf32>,
    %c1_74 = arith.constant 1 : index
    %c6_75 = arith.constant 6 : index
    %80 = memref.load %arg1[%c1_74, %c6_75] : memref<2x8xi32, #tpu.memory_space<smem>>
    %81 = arith.index_cast %80 : i32 to index
    %c0_76 = arith.constant 0 : index
    %82 = vector.load %arg2[%81, %c0_76] : memref<32x32xf32, #tpu.memory_space<vmem>>, vector<1x32xf32>
    %c6_77 = arith.constant 6 : index
    %c1_78 = arith.constant 1 : index
    %c0_79 = arith.constant 0 : index
    %83 = vector.load %arg5[%c6_77, %c1_78, %c0_79] : memref<8x8x32xf32, #tpu.memory_space<vmem>>, vector<1x1x32xf32>
    %84 = vector.shape_cast %83 : vector<1x1x32xf32> to vector<1x32xf32>
    %85 = vector.shape_cast %82 : vector<1x32xf32> to vector<1x1x32xf32>
    tpu.vector_store %arg5[%c6_77, %c1_78, %c0_79], %85 {strides = array<i32>} : memref<8x8x32xf32, #tpu.memory_space<vmem>>, vector<1x1x32xf32>,
    %c0_80 = arith.constant 0 : index
    %c7 = arith.constant 7 : index
    %86 = memref.load %arg1[%c0_80, %c7] : memref<2x8xi32, #tpu.memory_space<smem>>
    %87 = arith.index_cast %86 : i32 to index
    %c0_81 = arith.constant 0 : index
    %88 = vector.load %arg2[%87, %c0_81] : memref<32x32xf32, #tpu.memory_space<vmem>>, vector<1x32xf32>
    %c7_82 = arith.constant 7 : index
    %c0_83 = arith.constant 0 : index
    %c0_84 = arith.constant 0 : index
    %89 = vector.load %arg5[%c7_82, %c0_83, %c0_84] : memref<8x8x32xf32, #tpu.memory_space<vmem>>, vector<1x1x32xf32>
    %90 = vector.shape_cast %89 : vector<1x1x32xf32> to vector<1x32xf32>
    %91 = vector.shape_cast %88 : vector<1x32xf32> to vector<1x1x32xf32>
    tpu.vector_store %arg5[%c7_82, %c0_83, %c0_84], %91 {strides = array<i32>} : memref<8x8x32xf32, #tpu.memory_space<vmem>>, vector<1x1x32xf32>,
    %c1_85 = arith.constant 1 : index
    %c7_86 = arith.constant 7 : index
    %92 = memref.load %arg1[%c1_85, %c7_86] : memref<2x8xi32, #tpu.memory_space<smem>>
    %93 = arith.index_cast %92 : i32 to index
    %c0_87 = arith.constant 0 : index
    %94 = vector.load %arg2[%93, %c0_87] : memref<32x32xf32, #tpu.memory_space<vmem>>, vector<1x32xf32>
    %c7_88 = arith.constant 7 : index
    %c1_89 = arith.constant 1 : index
    %c0_90 = arith.constant 0 : index
    %95 = vector.load %arg5[%c7_88, %c1_89, %c0_90] : memref<8x8x32xf32, #tpu.memory_space<vmem>>, vector<1x1x32xf32>
    %96 = vector.shape_cast %95 : vector<1x1x32xf32> to vector<1x32xf32>
    %97 = vector.shape_cast %94 : vector<1x32xf32> to vector<1x1x32xf32>
    tpu.vector_store %arg5[%c7_88, %c1_89, %c0_90], %97 {strides = array<i32>} : memref<8x8x32xf32, #tpu.memory_space<vmem>>, vector<1x1x32xf32>,
    %c0_91 = arith.constant 0 : index
    %c0_92 = arith.constant 0 : index
    %98 = vector.load %arg3[%c0_91, %c0_92] : memref<32x32xf32, #tpu.memory_space<vmem>>, vector<32x32xf32>
    %cst_93 = arith.constant 0.000000e+00 : f32
    %99 = vector.broadcast %cst_93 : f32 to vector<8x32xf32>
    %c0_94 = arith.constant 0 : index
    %c0_95 = arith.constant 0 : index
    %c0_96 = arith.constant 0 : index
    %100 = vector.load %arg5[%c0_94, %c0_95, %c0_96] : memref<8x8x32xf32, #tpu.memory_space<vmem>>, vector<1x8x32xf32>
    %101 = vector.shape_cast %100 : vector<1x8x32xf32> to vector<8x32xf32>
    %cst_97 = arith.constant dense<0.000000e+00> : vector<8x32xf32>
    %102 = tpu.matmul %99, %98, %cst_97 {dimension_numbers = #tpu.dot_dimension_numbers<[1], [0], [0], [1], [0, 0, 1, 1], [], []>} : vector<8x32xf32>, vector<32x32xf32>, vector<8x32xf32> -> vector<8x32xf32>
    %103 = arith.addf %101, %102 : vector<8x32xf32>
    %104 = math.tanh %103 : vector<8x32xf32>
    %c1_98 = arith.constant 1 : index
    %c0_99 = arith.constant 0 : index
    %c0_100 = arith.constant 0 : index
    %105 = vector.load %arg5[%c1_98, %c0_99, %c0_100] : memref<8x8x32xf32, #tpu.memory_space<vmem>>, vector<1x8x32xf32>
    %106 = vector.shape_cast %105 : vector<1x8x32xf32> to vector<8x32xf32>
    %cst_101 = arith.constant dense<0.000000e+00> : vector<8x32xf32>
    %107 = tpu.matmul %104, %98, %cst_101 {dimension_numbers = #tpu.dot_dimension_numbers<[1], [0], [0], [1], [0, 0, 1, 1], [], []>} : vector<8x32xf32>, vector<32x32xf32>, vector<8x32xf32> -> vector<8x32xf32>
    %108 = arith.addf %106, %107 : vector<8x32xf32>
    %109 = math.tanh %108 : vector<8x32xf32>
    %c2_102 = arith.constant 2 : index
    %c0_103 = arith.constant 0 : index
    %c0_104 = arith.constant 0 : index
    %110 = vector.load %arg5[%c2_102, %c0_103, %c0_104] : memref<8x8x32xf32, #tpu.memory_space<vmem>>, vector<1x8x32xf32>
    %111 = vector.shape_cast %110 : vector<1x8x32xf32> to vector<8x32xf32>
    %cst_105 = arith.constant dense<0.000000e+00> : vector<8x32xf32>
    %112 = tpu.matmul %109, %98, %cst_105 {dimension_numbers = #tpu.dot_dimension_numbers<[1], [0], [0], [1], [0, 0, 1, 1], [], []>} : vector<8x32xf32>, vector<32x32xf32>, vector<8x32xf32> -> vector<8x32xf32>
    %113 = arith.addf %111, %112 : vector<8x32xf32>
    %114 = math.tanh %113 : vector<8x32xf32>
    %c3_106 = arith.constant 3 : index
    %c0_107 = arith.constant 0 : index
    %c0_108 = arith.constant 0 : index
    %115 = vector.load %arg5[%c3_106, %c0_107, %c0_108] : memref<8x8x32xf32, #tpu.memory_space<vmem>>, vector<1x8x32xf32>
    %116 = vector.shape_cast %115 : vector<1x8x32xf32> to vector<8x32xf32>
    %cst_109 = arith.constant dense<0.000000e+00> : vector<8x32xf32>
    %117 = tpu.matmul %114, %98, %cst_109 {dimension_numbers = #tpu.dot_dimension_numbers<[1], [0], [0], [1], [0, 0, 1, 1], [], []>} : vector<8x32xf32>, vector<32x32xf32>, vector<8x32xf32> -> vector<8x32xf32>
    %118 = arith.addf %116, %117 : vector<8x32xf32>
    %119 = math.tanh %118 : vector<8x32xf32>
    %c4_110 = arith.constant 4 : index
    %c0_111 = arith.constant 0 : index
    %c0_112 = arith.constant 0 : index
    %120 = vector.load %arg5[%c4_110, %c0_111, %c0_112] : memref<8x8x32xf32, #tpu.memory_space<vmem>>, vector<1x8x32xf32>
    %121 = vector.shape_cast %120 : vector<1x8x32xf32> to vector<8x32xf32>
    %cst_113 = arith.constant dense<0.000000e+00> : vector<8x32xf32>
    %122 = tpu.matmul %119, %98, %cst_113 {dimension_numbers = #tpu.dot_dimension_numbers<[1], [0], [0], [1], [0, 0, 1, 1], [], []>} : vector<8x32xf32>, vector<32x32xf32>, vector<8x32xf32> -> vector<8x32xf32>
    %123 = arith.addf %121, %122 : vector<8x32xf32>
    %124 = math.tanh %123 : vector<8x32xf32>
    %c5_114 = arith.constant 5 : index
    %c0_115 = arith.constant 0 : index
    %c0_116 = arith.constant 0 : index
    %125 = vector.load %arg5[%c5_114, %c0_115, %c0_116] : memref<8x8x32xf32, #tpu.memory_space<vmem>>, vector<1x8x32xf32>
    %126 = vector.shape_cast %125 : vector<1x8x32xf32> to vector<8x32xf32>
    %cst_117 = arith.constant dense<0.000000e+00> : vector<8x32xf32>
    %127 = tpu.matmul %124, %98, %cst_117 {dimension_numbers = #tpu.dot_dimension_numbers<[1], [0], [0], [1], [0, 0, 1, 1], [], []>} : vector<8x32xf32>, vector<32x32xf32>, vector<8x32xf32> -> vector<8x32xf32>
    %128 = arith.addf %126, %127 : vector<8x32xf32>
    %129 = math.tanh %128 : vector<8x32xf32>
    %c6_118 = arith.constant 6 : index
    %c0_119 = arith.constant 0 : index
    %c0_120 = arith.constant 0 : index
    %130 = vector.load %arg5[%c6_118, %c0_119, %c0_120] : memref<8x8x32xf32, #tpu.memory_space<vmem>>, vector<1x8x32xf32>
    %131 = vector.shape_cast %130 : vector<1x8x32xf32> to vector<8x32xf32>
    %cst_121 = arith.constant dense<0.000000e+00> : vector<8x32xf32>
    %132 = tpu.matmul %129, %98, %cst_121 {dimension_numbers = #tpu.dot_dimension_numbers<[1], [0], [0], [1], [0, 0, 1, 1], [], []>} : vector<8x32xf32>, vector<32x32xf32>, vector<8x32xf32> -> vector<8x32xf32>
    %133 = arith.addf %131, %132 : vector<8x32xf32>
    %134 = math.tanh %133 : vector<8x32xf32>
    %c7_122 = arith.constant 7 : index
    %c0_123 = arith.constant 0 : index
    %c0_124 = arith.constant 0 : index
    %135 = vector.load %arg5[%c7_122, %c0_123, %c0_124] : memref<8x8x32xf32, #tpu.memory_space<vmem>>, vector<1x8x32xf32>
    %136 = vector.shape_cast %135 : vector<1x8x32xf32> to vector<8x32xf32>
    %cst_125 = arith.constant dense<0.000000e+00> : vector<8x32xf32>
    %137 = tpu.matmul %134, %98, %cst_125 {dimension_numbers = #tpu.dot_dimension_numbers<[1], [0], [0], [1], [0, 0, 1, 1], [], []>} : vector<8x32xf32>, vector<32x32xf32>, vector<8x32xf32> -> vector<8x32xf32>
    %138 = arith.addf %136, %137 : vector<8x32xf32>
    %139 = math.tanh %138 : vector<8x32xf32>
    %140 = vector.extract_strided_slice %139 {offsets = [0, 0], sizes = [2, 32], strides = [1, 1]} : vector<8x32xf32> to vector<2x32xf32>
    %c0_126 = arith.constant 0 : index
    %c0_127 = arith.constant 0 : index
    %141 = vector.load %arg4[%c0_126, %c0_127] : memref<2x32xf32, #tpu.memory_space<vmem>>, vector<2x32xf32>
    tpu.vector_store %arg4[%c0_126, %c0_127], %140 {strides = array<i32>} : memref<2x32xf32, #tpu.memory_space<vmem>>, vector<2x32xf32>,
    return
  }
  func.func @transform_0(%arg0: i32, %arg1: memref<2x8xi32, #tpu.memory_space<smem>>) -> (i32, i32) {
    %c0_i32 = arith.constant 0 : i32
    %c0_i32_0 = arith.constant 0 : i32
    %c0_i32_1 = arith.constant 0 : i32
    return %c0_i32, %c0_i32_0 : i32, i32
  }
  func.func @transform_1(%arg0: i32, %arg1: memref<2x8xi32, #tpu.memory_space<smem>>) -> (i32, i32) {
    %c0_i32 = arith.constant 0 : i32
    %c0_i32_0 = arith.constant 0 : i32
    %c0_i32_1 = arith.constant 0 : i32
    return %c0_i32, %c0_i32_0 : i32, i32
  }
  func.func @transform_2(%arg0: i32, %arg1: memref<2x8xi32, #tpu.memory_space<smem>>) -> (i32, i32) {
    %c0_i32 = arith.constant 0 : i32
    %c0_i32_0 = arith.constant 0 : i32
    %c0_i32_1 = arith.constant 0 : i32
    return %c0_i32, %c0_i32_0 : i32, i32
  }
}

</mosaic_0001>

<bundles_post_ra>
// kernel: tpu_custom_call.1
= control target key start
LH: loop header
LB: loop body
LE: loop exit
PB: predicated region body
PF: predicated region fallthrough
CT: control target
= control target key end

     0   :  { %s519_s15 = smov [#allocation4]   ;;  %s589_s0 = inlined_call_operand.hbm [shape: s32[2,8], index: 0, kind: input, shape index: {}]   ;;  %s590_s1 = inlined_call_operand.hbm [shape: f32[32,32], index: 1, kind: input, shape index: {}]   ;;  %s591_s2 = inlined_call_operand.hbm [shape: f32[32,32], index: 2, kind: input, shape index: {}]   ;;  %s592_s3 = inlined_call_operand.hbm [shape: f32[2,32], index: 3, kind: output, shape index: {}]  }
   0x1   :  { %s9_s14 = sshll.u32 %s589_s0, 4  ;;  %s10_s14 = int_to_ptr.hbm [resolvable:$true] %s9_s14 }
   0x2   :  { %12 = dma.hbm_to_smem %s10_s14, 32, %s519_s15, [#allocation3] }
   0x3   :  { %511 = dma.done.wait [#allocation3], 32 }
   0x4   :  { %512 = vsyncadd [#allocation3], 4294967264 }
   0x5   :  { %15 = sfence }
   0x6   :  { %16 = vsyncpa [#allocation6], 0 }
   0x7   :  { %17 = vsyncpa [#allocation9], 0 }
   0x8   :  { %18 = vsyncpa [#allocation7], 0  ;;  %s23_s18 = sshll.u32 %s590_s1, 4  ;;  %s520_s19 = smov [#allocation5]   ;;  %s24_s18 = int_to_ptr.hbm [resolvable:$true] %s23_s18 }
   0x9   :  { %s25_s20 = sshll.u32 %s520_s19, 4  ;;  %s36_s0 = sshll.u32 %s591_s2, 4  ;;  %s26_s20 = int_to_ptr.vmem [resolvable:$true] %s25_s20  ;;  %s37_s0 = int_to_ptr.hbm [resolvable:$true] %s36_s0 }
   0xa   :  { %s521_s23 = smov 128   ;;  %s522_s24 = smov 8  }
   0xb   :  { %31 = dma.hbm_to_vmem [thread:$0]  %s24_s18, 512, %s26_s20, [#allocation6], %s521_s23, %s521_s23, %s522_s24  }
   0xc   :  { %s523_s25 = smov [#allocation8]  }
   0xd   :  { %s38_s26 = sshll.u32 %s523_s25, 4  ;;  %s39_s26 = int_to_ptr.vmem [resolvable:$true] %s38_s26 }
   0xe   :  { %44 = dma.hbm_to_vmem [thread:$0]  %s37_s0, 512, %s39_s26, [#allocation9], %s521_s23, %s521_s23, %s522_s24  }
   0xf   :  { %513 = dma.done.wait [#allocation6], 512  }
  0x10   :  { %514 = vsyncadd [#allocation6], 4294966784 }
  0x11   :  { %515 = dma.done.wait [#allocation9], 512  }
  0x12   :  { %516 = vsyncadd [#allocation9], 4294966784  ;;  %vm53_vm0 = vcmask 261120   ;;  %v524_v0 = vmov 0.0   ;;  %s62_s1 = sld [smem:[#allocation4]]  ;;  %vm65_vm1 = vcmask 253952  }
  0x13   :  { %54 = vst.msk [vmem:[#allocation2] sm:$0xff] %vm53_vm0, %v524_v0  ;;  %s382_s27 = sld [smem:[#allocation4 + $0x80]]  ;;  %v137_v1 = vld [vmem:[#allocation8 + $0x18] sm:$0xff]  ;;  %v136_v2 = vld [vmem:[#allocation8 + $0x10] sm:$0xff]  ;;  %v135_v4 = vld [vmem:[#allocation8 + $0x8] sm:$0xff]  ;;  %vm346_vm2 = vcmask 254976  }
  0x14   :  { %55 = vst.msk [vmem:[#allocation2 + $0x8] sm:$0xff] %vm53_vm0, %v524_v0  ;;  %154 = vmatpush.msra.mxu0 %v137_v1  ;;  %180 = vmatpush.msra.mxu1 %v137_v1  ;;  %v134_v6 = vld [vmem:[#allocation8] sm:$0xff]  ;;  %s383_s29 = sld [smem:[#allocation4 + $0x1]] }
  0x15   :  { %56 = vst.msk [vmem:[#allocation2 + $0x10] sm:$0xff] %vm53_vm0, %v524_v0  ;;  %206 = vmatpush.msra.mxu2 %v137_v1  ;;  %232 = vmatpush.msra.mxu3 %v137_v1  ;;  %s384_s30 = sld [smem:[#allocation4 + $0x81]] }
  0x16   :  { %57 = vst.msk [vmem:[#allocation2 + $0x18] sm:$0xff] %vm53_vm0, %v524_v0  ;;  %155 = vmatpush.msra.mxu0 %v136_v2  ;;  %181 = vmatpush.msra.mxu1 %v136_v2  ;;  %s385_s6 = sld [smem:[#allocation4 + $0x2]] }
  0x17   :  { %58 = vst.msk [vmem:[#allocation2 + $0x20] sm:$0xff] %vm53_vm0, %v524_v0  ;;  %207 = vmatpush.msra.mxu2 %v136_v2  ;;  %233 = vmatpush.msra.mxu3 %v136_v2  ;;  %s386_s7 = sld [smem:[#allocation4 + $0x82]] }
  0x18   :  { %59 = vst.msk [vmem:[#allocation2 + $0x28] sm:$0xff] %vm53_vm0, %v524_v0  ;;  %s63_s2 = scalar_lea.vmem [#allocation5], %s62_s1  ;;  %156 = vmatpush.msra.mxu0 %v135_v4  ;;  %182 = vmatpush.msra.mxu1 %v135_v4  ;;  %s387_s10 = sld [smem:[#allocation4 + $0x3]] }
  0x19   :  { %60 = vst.msk [vmem:[#allocation2 + $0x30] sm:$0xff] %vm53_vm0, %v524_v0  ;;  %v64_v3 = vld [vmem:[%s63_s2] sm:$0x1]  ;;  %s68_s28 = scalar_lea.vmem [#allocation5], %s382_s27  ;;  %208 = vmatpush.msra.mxu2 %v135_v4  ;;  %234 = vmatpush.msra.mxu3 %v135_v4  ;;  %s388_s11 = sld [smem:[#allocation4 + $0x83]] }
  0x1a   :  { %61 = vst.msk [vmem:[#allocation2 + $0x38] sm:$0xff] %vm53_vm0, %v524_v0  ;;  %v69_v5 = vld [vmem:[%s68_s28] sm:$0x1]  ;;  %157 = vmatpush.msra.mxu0 %v134_v6  ;;  %183 = vmatpush.msra.mxu1 %v134_v6  ;;  %s72_s4 = scalar_lea.vmem [#allocation5], %s383_s29  ;;  %s389_s14 = sld [smem:[#allocation4 + $0x4]] }
  0x1b   :  { %66 = vst.msk [vmem:[#allocation2] sm:$0x1] %vm65_vm1, %v64_v3  ;;  %158 = vmatmul.f32.vlgmr.msra.gmra.mxu0 %v524_v0  ;;  %209 = vmatpush.msra.mxu2 %v134_v6  ;;  %v73_v7 = vld [vmem:[%s72_s4] sm:$0x1]  ;;  %s77_s5 = scalar_lea.vmem [#allocation5], %s384_s30  ;;  %s390_s15 = sld [smem:[#allocation4 + $0x84]] }
  0x1c   :  { %70 = vst.msk [vmem:[#allocation2 + $0x1] sm:$0x1] %vm65_vm1, %v69_v5  ;;  %235 = vmatpush.msra.mxu3 %v134_v6  ;;  %258 = vmatpush.msrb.mxu0 %v137_v1  ;;  %v78_v8 = vld [vmem:[%s77_s5] sm:$0x1]  ;;  %s81_s8 = scalar_lea.vmem [#allocation5], %s385_s6  ;;  %s391_s18 = sld [smem:[#allocation4 + $0x5]] }
  0x1d   :  { %284 = vmatpush.msrb.mxu1 %v137_v1  ;;  %310 = vmatpush.msrb.mxu2 %v137_v1  ;;  %75 = vst.msk [vmem:[#allocation2 + $0x8] sm:$0x1] %vm65_vm1, %v73_v7  ;;  %v82_v13 = vld [vmem:[%s81_s8] sm:$0x1]  ;;  %s86_s9 = scalar_lea.vmem [#allocation5], %s386_s7  ;;  %s392_s19 = sld [smem:[#allocation4 + $0x85]] }
  0x1e   :  { %259 = vmatpush.msrb.mxu0 %v136_v2  ;;  %336 = vmatpush.msrb.mxu3 %v137_v1  ;;  %79 = vst.msk [vmem:[#allocation2 + $0x9] sm:$0x1] %vm65_vm1, %v78_v8  ;;  %v87_v14 = vld [vmem:[%s86_s9] sm:$0x1]  ;;  %s90_s12 = scalar_lea.vmem [#allocation5], %s387_s10  ;;  %s393_s22 = sld [smem:[#allocation4 + $0x6]] }
  0x1f   :  { %285 = vmatpush.msrb.mxu1 %v136_v2  ;;  %311 = vmatpush.msrb.mxu2 %v136_v2  ;;  %84 = vst.msk [vmem:[#allocation2 + $0x10] sm:$0x1] %vm65_vm1, %v82_v13  ;;  %v91_v19 = vld [vmem:[%s90_s12] sm:$0x1]  ;;  %s95_s13 = scalar_lea.vmem [#allocation5], %s388_s11  ;;  %s394_s0 = sld [smem:[#allocation4 + $0x86]] }
  0x20   :  { %260 = vmatpush.msrb.mxu0 %v135_v4  ;;  %337 = vmatpush.msrb.mxu3 %v136_v2  ;;  %88 = vst.msk [vmem:[#allocation2 + $0x11] sm:$0x1] %vm65_vm1, %v87_v14  ;;  %v96_v20 = vld [vmem:[%s95_s13] sm:$0x1]  ;;  %s99_s16 = scalar_lea.vmem [#allocation5], %s389_s14  ;;  %s395_s25 = sld [smem:[#allocation4 + $0x7]] }
  0x21   :  { %286 = vmatpush.msrb.mxu1 %v135_v4  ;;  %312 = vmatpush.msrb.mxu2 %v135_v4  ;;  %93 = vst.msk [vmem:[#allocation2 + $0x18] sm:$0x1] %vm65_vm1, %v91_v19  ;;  %v100_v25 = vld [vmem:[%s99_s16] sm:$0x1]  ;;  %s104_s17 = scalar_lea.vmem [#allocation5], %s390_s15  ;;  %s396_s26 = sld [smem:[#allocation4 + $0x87]] }
  0x22   :  { %261 = vmatpush.msrb.mxu0 %v134_v6  ;;  %338 = vmatpush.msrb.mxu3 %v135_v4  ;;  %97 = vst.msk [vmem:[#allocation2 + $0x19] sm:$0x1] %vm65_vm1, %v96_v20  ;;  %v105_v26 = vld [vmem:[%s104_s17] sm:$0x1]  ;;  %s108_s20 = scalar_lea.vmem [#allocation5], %s391_s18  ;;  %s525_s2 = smov [#allocation10]  }
  0x23   :  { %287 = vmatpush.msrb.mxu1 %v134_v6  ;;  %313 = vmatpush.msrb.mxu2 %v134_v6  ;;  %v138_v9 = vld [vmem:[#allocation2] sm:$0xff]  ;;  %102 = vst.msk [vmem:[#allocation2 + $0x20] sm:$0x1] %vm65_vm1, %v100_v25  ;;  %s113_s21 = scalar_lea.vmem [#allocation5], %s392_s19  ;;  %s353_s28 = sshll.u32 %s525_s2, 4  ;;  %s354_s28 = int_to_ptr.vmem [resolvable:$true] %s353_s28 }
  0x24   :  { %339 = vmatpush.msrb.mxu3 %v134_v6  ;;  %106 = vst.msk [vmem:[#allocation2 + $0x21] sm:$0x1] %vm65_vm1, %v105_v26  ;;  %v109_v31 = vld [vmem:[%s108_s20] sm:$0x1]  ;;  %s117_s23 = scalar_lea.vmem [#allocation5], %s393_s22  ;;  %s355_s4 = sshll.u32 %s592_s3, 4  ;;  %s356_s4 = int_to_ptr.hbm [resolvable:$true] %s355_s4 }
  0x25   :  { %v164_v15 = vld [vmem:[#allocation2 + $0x8] sm:$0xff]  ;;  %v114_v32 = vld [vmem:[%s113_s21] sm:$0x1]  ;;  %111 = vst.msk [vmem:[#allocation2 + $0x28] sm:$0x1] %vm65_vm1, %v109_v31  ;;  %s122_s24 = scalar_lea.vmem [#allocation5], %s394_s0 }
  0x26   :  { %115 = vst.msk [vmem:[#allocation2 + $0x29] sm:$0x1] %vm65_vm1, %v114_v32  ;;  %v118_v37 = vld [vmem:[%s117_s23] sm:$0x1]  ;;  %s126_s1 = scalar_lea.vmem [#allocation5], %s395_s25 }
  0x27   :  { %v190_v21 = vld [vmem:[#allocation2 + $0x10] sm:$0xff]  ;;  %v123_v38 = vld [vmem:[%s122_s24] sm:$0x1]  ;;  %120 = vst.msk [vmem:[#allocation2 + $0x30] sm:$0x1] %vm65_vm1, %v118_v37  ;;  %s131_s27 = scalar_lea.vmem [#allocation5], %s396_s26 }
  0x28   :  { %124 = vst.msk [vmem:[#allocation2 + $0x31] sm:$0x1] %vm65_vm1, %v123_v38  ;;  %v127_v43 = vld [vmem:[%s126_s1] sm:$0x1] }
  0x29   :  { %v216_v27 = vld [vmem:[#allocation2 + $0x18] sm:$0xff]  ;;  %v132_v44 = vld [vmem:[%s131_s27] sm:$0x1]  ;;  %129 = vst.msk [vmem:[#allocation2 + $0x38] sm:$0x1] %vm65_vm1, %v127_v43 }
  0x2a   :  { %133 = vst.msk [vmem:[#allocation2 + $0x39] sm:$0x1] %vm65_vm1, %v132_v44 }
  0x2b   :  { %v242_v33 = vld [vmem:[#allocation2 + $0x20] sm:$0xff] }
  0x2d   :  { %v268_v39 = vld [vmem:[#allocation2 + $0x28] sm:$0xff] }
  0x2f   :  { %v294_v45 = vld [vmem:[#allocation2 + $0x30] sm:$0xff] }
  0x31   :  { %v320_v49 = vld [vmem:[#allocation2 + $0x38] sm:$0xff] }
  0x98   :  { %v159_v10 = vpop.f32.mrf.mxu0 }
  0x99   :  { %v162_v11 = vadd.f32 %v159_v10, %v138_v9 }
  0x9b   :  { %411 = vtanh.f32 %v162_v11 }
  0xa1   :  { %v412_v12 = vpop.eup %411 }
  0xa2   :  { %397 = vmatmul.msk.f32.vlgmr.msra.gmra.mxu1 %vm53_vm0, %v412_v12 }
 0x11f   :  { %v185_v16 = vpop.f32.mrf.mxu1 }
 0x120   :  { %v188_v17 = vadd.f32 %v185_v16, %v164_v15 }
 0x122   :  { %413 = vtanh.f32 %v188_v17 }
 0x128   :  { %v414_v18 = vpop.eup %413 }
 0x129   :  { %398 = vmatmul.msk.f32.vlgmr.msra.gmra.mxu2 %vm53_vm0, %v414_v18 }
 0x1ac   :  { %v211_v22 = vpop.f32.mrf.mxu2 }
 0x1ad   :  { %v214_v23 = vadd.f32 %v211_v22, %v190_v21 }
 0x1af   :  { %415 = vtanh.f32 %v214_v23 }
 0x1b5   :  { %v416_v24 = vpop.eup %415 }
 0x1b6   :  { %399 = vmatmul.msk.f32.vlgmr.msra.gmra.mxu3 %vm53_vm0, %v416_v24 }
 0x239   :  { %v237_v28 = vpop.f32.mrf.mxu3 }
 0x23a   :  { %v240_v29 = vadd.f32 %v237_v28, %v216_v27 }
 0x23c   :  { %417 = vtanh.f32 %v240_v29 }
 0x242   :  { %v418_v30 = vpop.eup %417 }
 0x243   :  { %400 = vmatmul.msk.f32.vlgmr.msrb.gmra.mxu0 %vm53_vm0, %v418_v30 }
 0x2c0   :  { %v263_v34 = vpop.f32.mrf.mxu0 }
 0x2c1   :  { %v266_v35 = vadd.f32 %v263_v34, %v242_v33 }
 0x2c3   :  { %419 = vtanh.f32 %v266_v35 }
 0x2c9   :  { %v420_v36 = vpop.eup %419 }
 0x2ca   :  { %401 = vmatmul.msk.f32.vlgmr.msrb.gmra.mxu1 %vm53_vm0, %v420_v36 }
 0x347   :  { %v289_v40 = vpop.f32.mrf.mxu1 }
 0x348   :  { %v292_v41 = vadd.f32 %v289_v40, %v268_v39 }
 0x34a   :  { %421 = vtanh.f32 %v292_v41 }
 0x350   :  { %v422_v42 = vpop.eup %421 }
 0x351   :  { %402 = vmatmul.msk.f32.vlgmr.msrb.gmra.mxu2 %vm53_vm0, %v422_v42 }
 0x3d4   :  { %v315_v46 = vpop.f32.mrf.mxu2 }
 0x3d5   :  { %v318_v47 = vadd.f32 %v315_v46, %v294_v45 }
 0x3d7   :  { %423 = vtanh.f32 %v318_v47 }
 0x3dd   :  { %v424_v48 = vpop.eup %423 }
 0x3de   :  { %403 = vmatmul.msk.f32.vlgmr.msrb.gmra.mxu3 %vm53_vm0, %v424_v48 }
 0x461   :  { %v341_v50 = vpop.f32.mrf.mxu3 }
 0x462   :  { %v344_v51 = vadd.f32 %v341_v50, %v320_v49 }
 0x464   :  { %425 = vtanh.f32 %v344_v51 }
 0x46a   :  { %v426_v52 = vpop.eup %425 }
 0x46b   :  { %347 = vst.msk [vmem:[#allocation10] sm:$0x3] %vm346_vm2, %v426_v52 }
 0x46c   :  { %358 = dma.vmem_to_hbm [thread:$0]  %s354_s28, 32, %s356_s4, [#allocation7]  }
 0x46d   :  { %517 = dma.done.wait [#allocation7], 32  }
 0x46e   :  { %518 = vsyncadd [#allocation7], 4294967264 }
 0x46f   :  { %363 = vsyncpa [#allocation6], 1 }
 0x470   :  { %364 = vsyncpa [#allocation9], 1 }
 0x471   :  { %365 = vsyncpa [#allocation7], 1 }

</bundles_post_ra>
